<compile_context>
chip_gen: v6e
topology: v6e:2x2x1
jax: 0.10.0
libtpu: 0.0.40
codegen_flags: <defaults>
</compile_context>

<pallas_src>
import functools

import jax
import jax.numpy as jnp
from jax.experimental import pallas as pl
from jax.experimental.pallas import tpu as pltpu

_LANE = 128
_SUBLANE = 8
_CHUNK_ROWS = 512                      # in-kernel sub-chunk (bounds temporaries)
_TARGET_BLOCK_BYTES = 4 * 1024 * 1024  # per operand, per pipeline buffer
_VMEM_LIMIT_BYTES = 32 * 1024 * 1024   # 2 ops x 2 bufs x 4 MiB + headroom


def _round_up(a, b):
    return ((a + b - 1) // b) * b


def _charbonnier_partial_kernel(x_ref, y_ref, partial_ref, *, eps, rows_valid,
                                tile_rows, chunk_rows, need_mask):
    """Writes the (8, 128) partial sum of sqrt((x-y)^2 + eps) for this block."""
    num_chunks = tile_rows // chunk_rows
    block_row0 = pl.program_id(0) * tile_rows

    def chunk_sum(c):
        r0 = pl.multiple_of(c * chunk_rows, chunk_rows)
        x = x_ref[pl.ds(r0, chunk_rows), :].astype(jnp.float32)
        y = y_ref[pl.ds(r0, chunk_rows), :].astype(jnp.float32)
        d = x - y
        err = jnp.sqrt(d * d + eps)
        if need_mask:
            # Zero rows past the end of the (unpadded) slab.  Only emitted when
            # the slab isn't an exact multiple of the tile; for non-last blocks
            # the predicate is uniformly true (cheap VPU select, hidden by DMA).
            row = (block_row0 + r0
                   + jax.lax.broadcasted_iota(jnp.int32, err.shape, 0))
            err = jnp.where(row < rows_valid, err, 0.0)
        # Sublane-axis-only partial reduction (pure VPU adds).
        return jnp.sum(err.reshape(-1, _SUBLANE, _LANE), axis=0)

    if num_chunks == 1:
        partial_ref[...] = chunk_sum(0)
    else:
        acc0 = jnp.zeros((_SUBLANE, _LANE), jnp.float32)
        acc = jax.lax.fori_loop(0, num_chunks, lambda c, a: a + chunk_sum(c),
                                acc0)
        partial_ref[...] = acc


def l1_charbonnier_loss(x, y, *, eps=1e-6):
    """Pallas equivalent of L1CharbonnierLoss.forward: mean(sqrt((x-y)^2+eps))."""
    assert x.shape == y.shape
    total = int(x.size)
    assert total > 0
    eps = float(eps)

    xf = x.reshape(-1)
    yf = y.reshape(-1)

    rows_main = total // _LANE
    lane_tail = total - rows_main * _LANE

    total_sum = jnp.float32(0.0)

    if rows_main > 0:
        main_elems = rows_main * _LANE
        # Prefix slice is only taken for lane-ragged inputs (rare for real
        # tensors); lane-aligned inputs incur zero extra HBM traffic.
        # TODO(synk): XLA may materialize this prefix slice as a copy for
        # ragged inputs; fold the last partial row into the kernel with a lane
        # mask if that ever shows up in profiles.
        xm = xf if lane_tail == 0 else xf[:main_elems]
        ym = yf if lane_tail == 0 else yf[:main_elems]
        x2 = xm.reshape(rows_main, _LANE)
        y2 = ym.reshape(rows_main, _LANE)

        isz_x = jnp.dtype(x.dtype).itemsize
        isz_y = jnp.dtype(y.dtype).itemsize
        # Dtype-aware sublane packing: 8 rows (4B), 16 rows (2B), 32 rows (1B).
        sublane_mult = _SUBLANE * max(1, 4 // min(isz_x, isz_y))
        # Bytes-based tile: ~4 MiB of input per operand per buffer.
        max_tile_rows = max(sublane_mult,
                            _TARGET_BLOCK_BYTES // (_LANE * max(isz_x, isz_y)))

        tile_rows = min(max_tile_rows, _round_up(rows_main, sublane_mult))
        if tile_rows > _CHUNK_ROWS:
            tile_rows = _round_up(tile_rows, _CHUNK_ROWS)
            chunk_rows = _CHUNK_ROWS
        else:
            chunk_rows = tile_rows

        num_blocks = pl.cdiv(rows_main, tile_rows)
        need_mask = (rows_main % tile_rows) != 0

        kernel = functools.partial(
            _charbonnier_partial_kernel, eps=eps, rows_valid=rows_main,
            tile_rows=tile_rows, chunk_rows=chunk_rows, need_mask=need_mask)

        cost = pl.CostEstimate(
            flops=5 * main_elems,
            transcendentals=main_elems,
            bytes_accessed=(main_elems * isz_x + main_elems * isz_y
                            + num_blocks * _SUBLANE * _LANE * 4),
        )

        partials = pl.pallas_call(
            kernel,
            out_shape=jax.ShapeDtypeStruct((num_blocks, _SUBLANE, _LANE),
                                           jnp.float32),
            grid_spec=pltpu.PrefetchScalarGridSpec(
                num_scalar_prefetch=0,
                grid=(num_blocks,),
                in_specs=[
                    pl.BlockSpec((tile_rows, _LANE), lambda i: (i, 0)),
                    pl.BlockSpec((tile_rows, _LANE), lambda i: (i, 0)),
                ],
                out_specs=pl.BlockSpec((None, _SUBLANE, _LANE),
                                       lambda i: (i, 0, 0)),
            ),
            compiler_params=pltpu.CompilerParams(
                # Independent per-block partials -> fully parallel grid.
                dimension_semantics=("parallel",),
                vmem_limit_bytes=_VMEM_LIMIT_BYTES,
            ),
            cost_estimate=cost,
        )(x2, y2)

        total_sum = total_sum + jnp.sum(partials, dtype=jnp.float32)

    if lane_tail:
        # <128-element lane tail: negligible, do it in plain jnp.
        tx = xf[rows_main * _LANE:].astype(jnp.float32)
        ty = yf[rows_main * _LANE:].astype(jnp.float32)
        td = tx - ty
        total_sum = total_sum + jnp.sum(jnp.sqrt(td * td + eps),
                                        dtype=jnp.float32)

    return total_sum / jnp.float32(total)


def _ref_loss(x, y, eps=1e-6):
    d = x.astype(jnp.float32) - y.astype(jnp.float32)
    return jnp.mean(jnp.sqrt(d * d + eps))


if __name__ == "__main__":
    key = jax.random.PRNGKey(0)
    kx, ky = jax.random.split(key)
    loss_fn = jax.jit(l1_charbonnier_loss)

    # 1) NCHW, lane-aligned (matches the PyTorch convention): single block,
    #    no masking.
    shape = (2, 4, 16, 16)
    x = jax.random.normal(kx, shape, dtype=jnp.float32)
    y = jax.random.normal(ky, shape, dtype=jnp.float32)
    loss = jax.block_until_ready(loss_fn(x, y))
    ref = _ref_loss(x, y)
    assert jnp.allclose(loss, ref, rtol=1e-5, atol=1e-6), (loss, ref)

    # 2) Tiny, <128 elements: pure tail-epilogue path.
    shape2 = (3, 5, 7)
    x2 = jax.random.normal(kx, shape2, dtype=jnp.float32)
    y2 = jax.random.normal(ky, shape2, dtype=jnp.float32)
    loss2 = jax.block_until_ready(loss_fn(x2, y2))
    ref2 = _ref_loss(x2, y2)
    assert jnp.allclose(loss2, ref2, rtol=1e-5, atol=1e-6), (loss2, ref2)

    # 3) Ragged: exercises in-kernel row masking, the sub-chunk loop, a block
    #    larger than the slab, and the lane-tail epilogue.
    shape3 = (1, 4, 129, 130)
    x3 = jax.random.normal(kx, shape3, dtype=jnp.float32)
    y3 = jax.random.normal(ky, shape3, dtype=jnp.float32)
    loss3 = jax.block_until_ready(loss_fn(x3, y3))
    ref3 = _ref_loss(x3, y3)
    assert jnp.allclose(loss3, ref3, rtol=1e-5, atol=1e-6), (loss3, ref3)

    # 4) bf16 inputs: exercises the dtype-aware (16-row sublane) path with the
    #    native-dtype HBM stream and in-kernel f32 upcast.
    x4 = jax.random.normal(kx, shape, dtype=jnp.bfloat16)
    y4 = jax.random.normal(ky, shape, dtype=jnp.bfloat16)
    loss4 = jax.block_until_ready(loss_fn(x4, y4))
    ref4 = _ref_loss(x4, y4)
    assert jnp.allclose(loss4, ref4, rtol=1e-4, atol=1e-5), (loss4, ref4)

    print("KERNEL_OK")
</pallas_src>

<mosaic_0001>
module attributes {stable_mosaic.version = 11 : i64} {
  func.func @_charbonnier_partial_kernel(%arg0: i32, %arg1: memref<16x128xf32, #tpu.memory_space<vmem>>, %arg2: memref<16x128xf32, #tpu.memory_space<vmem>>, %arg3: memref<1x8x128xf32, #tpu.memory_space<vmem>>) attributes {dimension_semantics = [#tpu.dimension_semantics<parallel>], iteration_bounds = array<i64: 1>, scalar_prefetch = 0 : i64, scratch_operands = 0 : i64, tpu.core_type = #tpu.core_type<tc>, window_params = [{transform_indices = @transform_0, window_bounds = array<i64: 16, 128>}, {transform_indices = @transform_1, window_bounds = array<i64: 16, 128>}, {transform_indices = @transform_2, window_bounds = array<i64: 1, 8, 128>}]} {
    %c0_i32 = arith.constant 0 : i32
    %0 = tpu.assume_multiple %c0_i32, 16 : i32
    %1 = arith.index_cast %0 : i32 to index
    %c0 = arith.constant 0 : index
    %2 = vector.load %arg1[%1, %c0] : memref<16x128xf32, #tpu.memory_space<vmem>>, vector<16x128xf32>
    %3 = arith.index_cast %0 : i32 to index
    %c0_0 = arith.constant 0 : index
    %4 = vector.load %arg2[%3, %c0_0] : memref<16x128xf32, #tpu.memory_space<vmem>>, vector<16x128xf32>
    %5 = arith.subf %2, %4 : vector<16x128xf32>
    %6 = arith.mulf %5, %5 : vector<16x128xf32>
    %cst = arith.constant 9.99999997E-7 : f32
    %7 = vector.broadcast %cst : f32 to vector<16x128xf32>
    %8 = arith.addf %6, %7 : vector<16x128xf32>
    %9 = math.sqrt %8 : vector<16x128xf32>
    %10 = vector.shape_cast %9 : vector<16x128xf32> to vector<2x8x128xf32>
    %cst_1 = arith.constant dense<0.000000e+00> : vector<8x128xf32>
    %11 = vector.multi_reduction <add>, %10, %cst_1 [0] : vector<2x8x128xf32> to vector<8x128xf32>
    %c0_2 = arith.constant 0 : index
    %c0_3 = arith.constant 0 : index
    %c0_4 = arith.constant 0 : index
    %12 = vector.load %arg3[%c0_2, %c0_3, %c0_4] : memref<1x8x128xf32, #tpu.memory_space<vmem>>, vector<1x8x128xf32>
    %13 = vector.shape_cast %12 : vector<1x8x128xf32> to vector<8x128xf32>
    %14 = vector.shape_cast %11 : vector<8x128xf32> to vector<1x8x128xf32>
    tpu.vector_store %arg3[%c0_2, %c0_3, %c0_4], %14 {strides = array<i32>} : memref<1x8x128xf32, #tpu.memory_space<vmem>>, vector<1x8x128xf32>,
    return
  }
  func.func @transform_0(%arg0: i32) -> (i32, i32) {
    %c0_i32 = arith.constant 0 : i32
    %c0_i32_0 = arith.constant 0 : i32
    return %arg0, %c0_i32 : i32, i32
  }
  func.func @transform_1(%arg0: i32) -> (i32, i32) {
    %c0_i32 = arith.constant 0 : i32
    %c0_i32_0 = arith.constant 0 : i32
    return %arg0, %c0_i32 : i32, i32
  }
  func.func @transform_2(%arg0: i32) -> (i32, i32, i32) {
    %c0_i32 = arith.constant 0 : i32
    %c0_i32_0 = arith.constant 0 : i32
    %c0_i32_1 = arith.constant 0 : i32
    return %arg0, %c0_i32, %c0_i32_0 : i32, i32, i32
  }
}

</mosaic_0001>

<bundles_post_ra>
// kernel: l1_charbonnier_loss.1
= control target key start
LH: loop header
LB: loop body
LE: loop exit
PB: predicated region body
PF: predicated region fallthrough
CT: control target
= control target key end

     0   :  { %s75_s0 = inlined_call_operand.vmem [shape: f32[16,128], index: 0, kind: input, shape index: {}]   ;;  %s76_s1 = inlined_call_operand.vmem [shape: f32[16,128], index: 1, kind: input, shape index: {}]   ;;  %s77_s2 = inlined_call_operand.vmem [shape: f32[1,8,128], index: 2, kind: output, shape index: {}]  }
   0x1   :  { %v11_v0 = vld [vmem:[%s75_s0] sm:$0xff]  ;;  %v12_v1 = vld [vmem:[%s75_s0 + $0x8] sm:$0xff] }
   0x2   :  { %v13_v2 = vld [vmem:[%s76_s1] sm:$0xff]  ;;  %v14_v3 = vld [vmem:[%s76_s1 + $0x8] sm:$0xff] }
   0x3   :  { %v15_v4 = vsub.f32 %v11_v0, %v13_v2  ;;  %v16_v5 = vsub.f32 %v12_v1, %v14_v3 }
   0x5   :  { %v17_v6 = vmul.f32 %v15_v4, %v15_v4  ;;  %v18_v7 = vmul.f32 %v16_v5, %v16_v5 }
   0x7   :  { %v19_v8 = vadd.f32 1e-06, %v17_v6  ;;  %v20_v9 = vadd.f32 1e-06, %v18_v7 }
   0x9   :  { %41 = vrsqrt.f32 %v19_v8  ;;  %vm23_vm0 = vcmp.eq.f32.partialorder %v19_v8, inf  ;;  %v26_v11 = vand.u32 2147483648, %v19_v8  ;;  %vm25_vm1 = vcmp.eq.f32.partialorder %v19_v8, 0.0 }
   0xa   :  { %43 = vrsqrt.f32 %v20_v9  ;;  %vm30_vm2 = vcmp.eq.f32.partialorder %v20_v9, inf  ;;  %v33_v14 = vand.u32 2147483648, %v20_v9  ;;  %vm32_vm3 = vcmp.eq.f32.partialorder %v20_v9, 0.0 }
  0x16   :  { %v42_v10 = vpop.eup %41 }
  0x17   :  { %v44_v12 = vpop.eup %43  ;;  %v22_v13 = vmul.f32 %v42_v10, %v19_v8 }
  0x18   :  { %v29_v15 = vmul.f32 %v44_v12, %v20_v9 }
  0x19   :  { %v24_v16 = vsel %vm23_vm0, %v19_v8, %v22_v13 }
  0x1a   :  { %v27_v17 = vsel %vm25_vm1, %v26_v11, %v24_v16  ;;  %v31_v18 = vsel %vm30_vm2, %v20_v9, %v29_v15 }
  0x1b   :  { %v34_v19 = vsel %vm32_vm3, %v33_v14, %v31_v18 }
  0x1c   :  { %v35_v20 = vadd.f32 %v34_v19, %v27_v17 }
  0x1e   :  { %36 = vst [vmem:[%s77_s2] sm:$0xff] %v35_v20 }

</bundles_post_ra>
